<compile_context>
chip_gen: v6e
topology: v6e:2x2x1
jax: 0.10.0
libtpu: 0.0.40
codegen_flags: <defaults>
</compile_context>

<pallas_src>
import math

import jax
import jax.numpy as jnp
from jax import lax
from jax.experimental import pallas as pl
from jax.experimental.pallas import tpu as pltpu


def _flash_sdpa_kernel(q_ref, k_ref, v_ref, mask_ref, o_ref, m_sc, l_sc, acc_sc):
    """One (bh-block, q-tile, kv-tile) step of online-softmax attention.

    q_ref:    (Bb, Tq, D)  bf16, pre-scaled by 1/sqrt(D)
    k_ref:    (Bb, Tk, D)  bf16
    v_ref:    (Bb, Tk, D)  bf16
    mask_ref: (Bb, Tq, Tk) int8 (1 = masked out)
    o_ref:    (Bb, Tq, D)  output dtype
    scratch:  m_sc/l_sc (Bb, Tq, 1) f32, acc_sc (Bb, Tq, D) f32
    """
    kv_idx = pl.program_id(2)

    @pl.when(kv_idx == 0)
    def _init():
        m_sc[...] = jnp.full(m_sc.shape, -jnp.inf, dtype=m_sc.dtype)
        l_sc[...] = jnp.zeros(l_sc.shape, dtype=l_sc.dtype)
        acc_sc[...] = jnp.zeros(acc_sc.shape, dtype=acc_sc.dtype)

    q = q_ref[...]
    k = k_ref[...]
    v = v_ref[...]

    # scores = (Q / sqrt(D)) @ K^T -- contract the last dims of both operands
    # directly (no explicit K transpose), batched over the (batch*head) block.
    scores = lax.dot_general(
        q, k,
        dimension_numbers=(((2,), (2,)), ((0,), (0,))),
        preferred_element_type=jnp.float32,
    )  # (Bb, Tq, Tk) float32

    # masked_fill_(attn_mask, -1e9), applied in f32 before any downcast.
    maskf = mask_ref[...].astype(jnp.float32)
    scores = jnp.where(maskf != 0.0, jnp.float32(-1000000000.0), scores)

    # Online (flash) softmax update, all statistics in f32.
    m_prev = m_sc[...]
    m_new = jnp.maximum(m_prev, jnp.max(scores, axis=-1, keepdims=True))
    alpha = jnp.exp(m_prev - m_new)            # rescale factor for old stats
    p = jnp.exp(scores - m_new)                # (Bb, Tq, Tk) f32
    l_sc[...] = alpha * l_sc[...] + jnp.sum(p, axis=-1, keepdims=True)

    pv = lax.dot_general(
        p.astype(v.dtype), v,                  # bf16 x bf16 -> f32 accumulate
        dimension_numbers=(((2,), (1,)), ((0,), (0,))),
        preferred_element_type=jnp.float32,
    )  # (Bb, Tq, D) float32
    acc_sc[...] = alpha * acc_sc[...] + pv
    m_sc[...] = m_new

    @pl.when(kv_idx == pl.num_programs(2) - 1)
    def _finalize():
        inv_l = pl.reciprocal(l_sc[...], approx=True)   # EUP slot, frees VPU
        o_ref[...] = (acc_sc[...] * inv_l).astype(o_ref.dtype)


def _pick_tile(dim, cap, align):
    """Largest divisor of `dim` that is <= cap and a multiple of `align`,
    falling back to the full dimension (always legal)."""
    if dim <= cap:
        return dim
    start = cap - (cap % align)
    for t in range(start, 0, -align):
        if dim % t == 0:
            return t
    return dim


def _pick_bh_block(bh, per_bh_bytes, budget_bytes):
    best = 1
    for b in range(1, bh + 1):
        if bh % b == 0 and b * per_bh_bytes <= budget_bytes:
            best = b
    return best


def scaled_dot_product_attention(Q, K, V, attn_mask):
    """Q, K, V: [B, H, S, D]; attn_mask: [B, H, S, S] bool/int (True = masked)."""
    B, H, S, D = Q.shape
    BH = B * H
    out_dtype = Q.dtype

    # Tile sizes: query tiles multiple of 32 (sublane-safe for f32/bf16/int8),
    # KV tiles multiple of 128 (lane-aligned), unless a tile spans the full axis.
    tq = _pick_tile(S, 256, 32)
    tk = _pick_tile(S, 512, 128)

    # Pack several (batch, head) slices per grid step when tiles are small so
    # per-step pipeline overhead is amortized; keep the per-step footprint
    # conservative (fits v7x 64 MiB physical and v5e's 16 MiB scoped default
    # with double-buffered inputs/outputs).
    itemsize_out = jnp.dtype(out_dtype).itemsize
    per_bh = (2 * (tq * D * 2 + 2 * tk * D * 2 + tq * tk * 1 + tq * D * itemsize_out)
              + (tq * D + 2 * tq) * 4)
    bh_blk = _pick_bh_block(BH, per_bh, 8 * 1024 * 1024)

    scale = 1.0 / math.sqrt(D)
    # Fold 1/sqrt(D) into Q once (O(S*D) instead of O(S*S)); bf16 MXU operands
    # with f32 accumulation; mask shipped as int8 (4x less HBM than int32).
    q = (Q.reshape(BH, S, D) * jnp.float32(scale)).astype(jnp.bfloat16)
    k = K.reshape(BH, S, D).astype(jnp.bfloat16)
    v = V.reshape(BH, S, D).astype(jnp.bfloat16)
    mask = attn_mask.reshape(BH, S, S).astype(jnp.int8)

    grid = (BH // bh_blk, S // tq, S // tk)

    out = pl.pallas_call(
        _flash_sdpa_kernel,
        out_shape=jax.ShapeDtypeStruct((BH, S, D), out_dtype),
        grid=grid,
        in_specs=[
            pl.BlockSpec((bh_blk, tq, D), lambda b, qi, ki: (b, qi, 0)),
            pl.BlockSpec((bh_blk, tk, D), lambda b, qi, ki: (b, ki, 0)),
            pl.BlockSpec((bh_blk, tk, D), lambda b, qi, ki: (b, ki, 0)),
            pl.BlockSpec((bh_blk, tq, tk), lambda b, qi, ki: (b, qi, ki)),
        ],
        out_specs=pl.BlockSpec((bh_blk, tq, D), lambda b, qi, ki: (b, qi, 0)),
        scratch_shapes=[
            pltpu.VMEM((bh_blk, tq, 1), jnp.float32),   # running max
            pltpu.VMEM((bh_blk, tq, 1), jnp.float32),   # running denom
            pltpu.VMEM((bh_blk, tq, D), jnp.float32),   # output accumulator
        ],
        compiler_params=pltpu.CompilerParams(
            dimension_semantics=("parallel", "parallel", "arbitrary"),
        ),
    )(q, k, v, mask)
    return out.reshape(B, H, S, D)


def _reference(Q, K, V, attn_mask):
    # Plain-JAX reference mirroring the PyTorch forward (eval-mode dropout).
    d = Q.shape[-1]
    scores = jnp.einsum("bhqd,bhkd->bhqk", Q, K) / math.sqrt(d)
    scores = jnp.where(attn_mask, -1000000000.0, scores)
    attn = jax.nn.softmax(scores, axis=-1)
    return jnp.einsum("bhqk,bhkd->bhqd", attn, V)


if __name__ == "__main__":
    B, H, S, D = 2, 4, 8, 32
    key = jax.random.PRNGKey(0)
    kq, kk, kv, km = jax.random.split(key, 4)

    Q = jax.random.normal(kq, (B, H, S, D), dtype=jnp.float32)
    K = jax.random.normal(kk, (B, H, S, D), dtype=jnp.float32)
    V = jax.random.normal(kv, (B, H, S, D), dtype=jnp.float32)
    # Random boolean mask (True = masked out), ensure no fully-masked row.
    attn_mask = jax.random.bernoulli(km, p=0.25, shape=(B, H, S, S))
    attn_mask = attn_mask.at[..., 0].set(False)

    ctx = scaled_dot_product_attention(Q, K, V, attn_mask)
    jax.block_until_ready(ctx)

    ref = _reference(Q, K, V, attn_mask)
    assert ctx.shape == (B, H, S, D)
    # bf16 MXU operands + approximate reciprocal -> loosened tolerance vs f32.
    assert jnp.allclose(ctx, ref, atol=2e-2, rtol=2e-2), float(
        jnp.max(jnp.abs(ctx - ref)))

    print("KERNEL_OK")
</pallas_src>

<mosaic_0001>
module attributes {stable_mosaic.version = 11 : i64} {
  func.func @_flash_sdpa_kernel(%arg0: i32, %arg1: i32, %arg2: i32, %arg3: memref<8x8x32xbf16, #tpu.memory_space<vmem>>, %arg4: memref<8x8x32xbf16, #tpu.memory_space<vmem>>, %arg5: memref<8x8x32xbf16, #tpu.memory_space<vmem>>, %arg6: memref<8x8x8xi8, #tpu.memory_space<vmem>>, %arg7: memref<8x8x32xf32, #tpu.memory_space<vmem>>, %arg8: memref<8x8x1xf32, #tpu.memory_space<vmem>>, %arg9: memref<8x8x1xf32, #tpu.memory_space<vmem>>, %arg10: memref<8x8x32xf32, #tpu.memory_space<vmem>>) attributes {dimension_semantics = [#tpu.dimension_semantics<parallel>, #tpu.dimension_semantics<parallel>, #tpu.dimension_semantics<arbitrary>], iteration_bounds = array<i64: 1, 1, 1>, scalar_prefetch = 0 : i64, scratch_operands = 3 : i64, tpu.core_type = #tpu.core_type<tc>, window_params = [{transform_indices = @transform_0, window_bounds = array<i64: 8, 8, 32>}, {transform_indices = @transform_1, window_bounds = array<i64: 8, 8, 32>}, {transform_indices = @transform_2, window_bounds = array<i64: 8, 8, 32>}, {transform_indices = @transform_3, window_bounds = array<i64: 8, 8, 8>}, {transform_indices = @transform_4, window_bounds = array<i64: 8, 8, 32>}]} {
    %c0_i32 = arith.constant 0 : i32
    %0 = arith.cmpi eq, %arg2, %c0_i32 : i32
    %1 = arith.extui %0 : i1 to i32
    %c0_i32_0 = arith.constant 0 : i32
    %2 = arith.cmpi ne, %1, %c0_i32_0 : i32
    scf.if %2 {
      %cst_37 = arith.constant 0xFF800000 : f32
      %39 = vector.broadcast %cst_37 : f32 to vector<8x8x1xf32>
      %c0_38 = arith.constant 0 : index
      %c0_39 = arith.constant 0 : index
      %c0_40 = arith.constant 0 : index
      %40 = vector.load %arg8[%c0_38, %c0_39, %c0_40] : memref<8x8x1xf32, #tpu.memory_space<vmem>>, vector<8x8x1xf32>
      tpu.vector_store %arg8[%c0_38, %c0_39, %c0_40], %39 {strides = array<i32>} : memref<8x8x1xf32, #tpu.memory_space<vmem>>, vector<8x8x1xf32>,
      %cst_41 = arith.constant 0.000000e+00 : f32
      %41 = vector.broadcast %cst_41 : f32 to vector<8x8x1xf32>
      %c0_42 = arith.constant 0 : index
      %c0_43 = arith.constant 0 : index
      %c0_44 = arith.constant 0 : index
      %42 = vector.load %arg9[%c0_42, %c0_43, %c0_44] : memref<8x8x1xf32, #tpu.memory_space<vmem>>, vector<8x8x1xf32>
      tpu.vector_store %arg9[%c0_42, %c0_43, %c0_44], %41 {strides = array<i32>} : memref<8x8x1xf32, #tpu.memory_space<vmem>>, vector<8x8x1xf32>,
      %cst_45 = arith.constant 0.000000e+00 : f32
      %43 = vector.broadcast %cst_45 : f32 to vector<8x8x32xf32>
      %c0_46 = arith.constant 0 : index
      %c0_47 = arith.constant 0 : index
      %c0_48 = arith.constant 0 : index
      %44 = vector.load %arg10[%c0_46, %c0_47, %c0_48] : memref<8x8x32xf32, #tpu.memory_space<vmem>>, vector<8x8x32xf32>
      tpu.vector_store %arg10[%c0_46, %c0_47, %c0_48], %43 {strides = array<i32>} : memref<8x8x32xf32, #tpu.memory_space<vmem>>, vector<8x8x32xf32>,
    } else {
    }
    %c0 = arith.constant 0 : index
    %c0_1 = arith.constant 0 : index
    %c0_2 = arith.constant 0 : index
    %3 = vector.load %arg3[%c0, %c0_1, %c0_2] : memref<8x8x32xbf16, #tpu.memory_space<vmem>>, vector<8x8x32xbf16>
    %c0_3 = arith.constant 0 : index
    %c0_4 = arith.constant 0 : index
    %c0_5 = arith.constant 0 : index
    %4 = vector.load %arg4[%c0_3, %c0_4, %c0_5] : memref<8x8x32xbf16, #tpu.memory_space<vmem>>, vector<8x8x32xbf16>
    %c0_6 = arith.constant 0 : index
    %c0_7 = arith.constant 0 : index
    %c0_8 = arith.constant 0 : index
    %5 = vector.load %arg5[%c0_6, %c0_7, %c0_8] : memref<8x8x32xbf16, #tpu.memory_space<vmem>>, vector<8x8x32xbf16>
    %cst = arith.constant dense<0.000000e+00> : vector<8x8x8xf32>
    %6 = tpu.matmul %3, %4, %cst {dimension_numbers = #tpu.dot_dimension_numbers<[2], [2], [1], [1], [0, 0, 0, 1, 1, 1], [0], [0]>} : vector<8x8x32xbf16>, vector<8x8x32xbf16>, vector<8x8x8xf32> -> vector<8x8x8xf32>
    %c0_9 = arith.constant 0 : index
    %c0_10 = arith.constant 0 : index
    %c0_11 = arith.constant 0 : index
    %7 = vector.load %arg6[%c0_9, %c0_10, %c0_11] : memref<8x8x8xi8, #tpu.memory_space<vmem>>, vector<8x8x8xi8>
    %8 = arith.sitofp %7 : vector<8x8x8xi8> to vector<8x8x8xf32>
    %cst_12 = arith.constant 0.000000e+00 : f32
    %9 = vector.broadcast %cst_12 : f32 to vector<8x8x8xf32>
    %10 = arith.cmpf one, %8, %9 : vector<8x8x8xf32>
    %cst_13 = arith.constant -1.000000e+09 : f32
    %11 = vector.broadcast %cst_13 : f32 to vector<8x8x8xf32>
    %12 = arith.select %10, %11, %6 : vector<8x8x8xi1>, vector<8x8x8xf32>
    %c0_14 = arith.constant 0 : index
    %c0_15 = arith.constant 0 : index
    %c0_16 = arith.constant 0 : index
    %13 = vector.load %arg8[%c0_14, %c0_15, %c0_16] : memref<8x8x1xf32, #tpu.memory_space<vmem>>, vector<8x8x1xf32>
    %cst_17 = arith.constant dense<0xFF800000> : vector<8x8xf32>
    %14 = vector.multi_reduction <maximumf>, %12, %cst_17 [2] : vector<8x8x8xf32> to vector<8x8xf32>
    %15 = vector.shape_cast %14 : vector<8x8xf32> to vector<8x8x1xf32>
    %16 = arith.maximumf %13, %15 : vector<8x8x1xf32>
    %17 = arith.subf %13, %16 : vector<8x8x1xf32>
    %18 = math.exp %17 : vector<8x8x1xf32>
    %19 = vector.broadcast %16 : vector<8x8x1xf32> to vector<8x8x8xf32>
    %20 = arith.subf %12, %19 : vector<8x8x8xf32>
    %21 = math.exp %20 : vector<8x8x8xf32>
    %c0_18 = arith.constant 0 : index
    %c0_19 = arith.constant 0 : index
    %c0_20 = arith.constant 0 : index
    %22 = vector.load %arg9[%c0_18, %c0_19, %c0_20] : memref<8x8x1xf32, #tpu.memory_space<vmem>>, vector<8x8x1xf32>
    %23 = arith.mulf %18, %22 : vector<8x8x1xf32>
    %cst_21 = arith.constant dense<0.000000e+00> : vector<8x8xf32>
    %24 = vector.multi_reduction <add>, %21, %cst_21 [2] : vector<8x8x8xf32> to vector<8x8xf32>
    %25 = vector.shape_cast %24 : vector<8x8xf32> to vector<8x8x1xf32>
    %26 = arith.addf %23, %25 : vector<8x8x1xf32>
    %c0_22 = arith.constant 0 : index
    %c0_23 = arith.constant 0 : index
    %c0_24 = arith.constant 0 : index
    %27 = vector.load %arg9[%c0_22, %c0_23, %c0_24] : memref<8x8x1xf32, #tpu.memory_space<vmem>>, vector<8x8x1xf32>
    tpu.vector_store %arg9[%c0_22, %c0_23, %c0_24], %26 {strides = array<i32>} : memref<8x8x1xf32, #tpu.memory_space<vmem>>, vector<8x8x1xf32>,
    %28 = arith.truncf %21 : vector<8x8x8xf32> to vector<8x8x8xbf16>
    %cst_25 = arith.constant dense<0.000000e+00> : vector<8x8x32xf32>
    %29 = tpu.matmul %28, %5, %cst_25 {dimension_numbers = #tpu.dot_dimension_numbers<[2], [1], [1], [2], [0, 0, 0, 1, 1, 2], [0], [0]>} : vector<8x8x8xbf16>, vector<8x8x32xbf16>, vector<8x8x32xf32> -> vector<8x8x32xf32>
    %c0_26 = arith.constant 0 : index
    %c0_27 = arith.constant 0 : index
    %c0_28 = arith.constant 0 : index
    %30 = vector.load %arg10[%c0_26, %c0_27, %c0_28] : memref<8x8x32xf32, #tpu.memory_space<vmem>>, vector<8x8x32xf32>
    %31 = vector.broadcast %18 : vector<8x8x1xf32> to vector<8x8x32xf32>
    %32 = arith.mulf %31, %30 : vector<8x8x32xf32>
    %33 = arith.addf %32, %29 : vector<8x8x32xf32>
    %c0_29 = arith.constant 0 : index
    %c0_30 = arith.constant 0 : index
    %c0_31 = arith.constant 0 : index
    %34 = vector.load %arg10[%c0_29, %c0_30, %c0_31] : memref<8x8x32xf32, #tpu.memory_space<vmem>>, vector<8x8x32xf32>
    tpu.vector_store %arg10[%c0_29, %c0_30, %c0_31], %33 {strides = array<i32>} : memref<8x8x32xf32, #tpu.memory_space<vmem>>, vector<8x8x32xf32>,
    %c0_32 = arith.constant 0 : index
    %c0_33 = arith.constant 0 : index
    %c0_34 = arith.constant 0 : index
    %35 = vector.load %arg8[%c0_32, %c0_33, %c0_34] : memref<8x8x1xf32, #tpu.memory_space<vmem>>, vector<8x8x1xf32>
    tpu.vector_store %arg8[%c0_32, %c0_33, %c0_34], %16 {strides = array<i32>} : memref<8x8x1xf32, #tpu.memory_space<vmem>>, vector<8x8x1xf32>,
    %c0_i32_35 = arith.constant 0 : i32
    %36 = arith.cmpi eq, %arg2, %c0_i32_35 : i32
    %37 = arith.extui %36 : i1 to i32
    %c0_i32_36 = arith.constant 0 : i32
    %38 = arith.cmpi ne, %37, %c0_i32_36 : i32
    scf.if %38 {
      %c0_37 = arith.constant 0 : index
      %c0_38 = arith.constant 0 : index
      %c0_39 = arith.constant 0 : index
      %39 = vector.load %arg9[%c0_37, %c0_38, %c0_39] : memref<8x8x1xf32, #tpu.memory_space<vmem>>, vector<8x8x1xf32>
      %40 = tpu.reciprocal %39 {approx = true} : vector<8x8x1xf32> -> vector<8x8x1xf32>
      %c0_40 = arith.constant 0 : index
      %c0_41 = arith.constant 0 : index
      %c0_42 = arith.constant 0 : index
      %41 = vector.load %arg10[%c0_40, %c0_41, %c0_42] : memref<8x8x32xf32, #tpu.memory_space<vmem>>, vector<8x8x32xf32>
      %42 = vector.broadcast %40 : vector<8x8x1xf32> to vector<8x8x32xf32>
      %43 = arith.mulf %41, %42 : vector<8x8x32xf32>
      %c0_43 = arith.constant 0 : index
      %c0_44 = arith.constant 0 : index
      %c0_45 = arith.constant 0 : index
      %44 = vector.load %arg7[%c0_43, %c0_44, %c0_45] : memref<8x8x32xf32, #tpu.memory_space<vmem>>, vector<8x8x32xf32>
      tpu.vector_store %arg7[%c0_43, %c0_44, %c0_45], %43 {strides = array<i32>} : memref<8x8x32xf32, #tpu.memory_space<vmem>>, vector<8x8x32xf32>,
    } else {
    }
    return
  }
  func.func @transform_0(%arg0: i32, %arg1: i32, %arg2: i32) -> (i32, i32, i32) {
    %c0_i32 = arith.constant 0 : i32
    %c0_i32_0 = arith.constant 0 : i32
    return %arg0, %arg1, %c0_i32 : i32, i32, i32
  }
  func.func @transform_1(%arg0: i32, %arg1: i32, %arg2: i32) -> (i32, i32, i32) {
    %c0_i32 = arith.constant 0 : i32
    %c0_i32_0 = arith.constant 0 : i32
    return %arg0, %arg2, %c0_i32 : i32, i32, i32
  }
  func.func @transform_2(%arg0: i32, %arg1: i32, %arg2: i32) -> (i32, i32, i32) {
    %c0_i32 = arith.constant 0 : i32
    %c0_i32_0 = arith.constant 0 : i32
    return %arg0, %arg2, %c0_i32 : i32, i32, i32
  }
  func.func @transform_3(%arg0: i32, %arg1: i32, %arg2: i32) -> (i32, i32, i32) {
    %c0_i32 = arith.constant 0 : i32
    return %arg0, %arg1, %arg2 : i32, i32, i32
  }
  func.func @transform_4(%arg0: i32, %arg1: i32, %arg2: i32) -> (i32, i32, i32) {
    %c0_i32 = arith.constant 0 : i32
    %c0_i32_0 = arith.constant 0 : i32
    return %arg0, %arg1, %c0_i32 : i32, i32, i32
  }
}

</mosaic_0001>

<bundles_post_ra>
// kernel: tpu_custom_call.1
= control target key start
LH: loop header
LB: loop body
LE: loop exit
PB: predicated region body
PF: predicated region fallthrough
CT: control target
= control target key end

     0   :  { %9 = vsyncpa [#allocation6], 0  ;;  %s1969_s0 = inlined_call_operand.hbm [shape: bf16[8,8,32], index: 0, kind: input, shape index: {}]   ;;  %s1970_s1 = inlined_call_operand.hbm [shape: bf16[8,8,32], index: 1, kind: input, shape index: {}]   ;;  %s1971_s2 = inlined_call_operand.hbm [shape: bf16[8,8,32], index: 2, kind: input, shape index: {}]   ;;  %s1972_s3 = inlined_call_operand.hbm [shape: s8[8,8,8], index: 3, kind: input, shape index: {}]   ;;  %s1973_s4 = inlined_call_operand.hbm [shape: f32[8,8,32], index: 4, kind: output, shape index: {}]  }
   0x1   :  { %10 = vsyncpa [#allocation9], 0 }
   0x2   :  { %11 = vsyncpa [#allocation12], 0 }
   0x3   :  { %12 = vsyncpa [#allocation7], 0  ;;  %s1618_s15 = smov [#allocation8]   ;;  %s1619_s17 = smov [#allocation5]  }
   0x4   :  { %s30_s16 = sshll.u32 %s1618_s15, 4  ;;  %s18_s18 = sshll.u32 %s1619_s17, 4  ;;  %s31_s16 = int_to_ptr.vmem [resolvable:$true] %s30_s16  ;;  %s19_s18 = int_to_ptr.vmem [resolvable:$true] %s18_s18 }
   0x5   :  { %s1518_s19 = scalar_lea.vmem %s31_s16, 512  ;;  %p1523_p1 = scmp.lt.s32.totalorder %s31_s16, %s31_s16 }
   0x6   :  { %p1519_p0 = scmp.ne.s32.totalorder %s31_s16, %s1518_s19  ;;  %p1524_p2 = scmp.lt.s32.totalorder %s1518_s19, %s1518_s19 }
   0x8   :  { %p1525_p3 = por %p1524_p2, %p1523_p1 }
   0xa   :  { %p1526_p4 = pnand %p1525_p3, %p1519_p0 }
   0xc   :  { %1529 = shalt.err (!%p1526_p4)
}
   0xd   :  { %s1620_s20 = smov 64   ;;  %s1621_s21 = smov 4  }
   0xe   :  { %36 = dma.hbm_to_vmem [thread:$0]  %s1970_s1, 512, %s31_s16, [#allocation9], %s1620_s20, %s1620_s20, %s1621_s21  }
   0xf   :  { %s1538_s24 = scalar_lea.vmem %s19_s18, 512  ;;  %p1543_p6 = scmp.lt.s32.totalorder %s19_s18, %s19_s18 }
  0x10   :  { %p1539_p5 = scmp.ne.s32.totalorder %s19_s18, %s1538_s24  ;;  %p1544_p7 = scmp.lt.s32.totalorder %s1538_s24, %s1538_s24 }
  0x12   :  { %p1545_p8 = por %p1544_p7, %p1543_p6 }
  0x14   :  { %p1546_p9 = pnand %p1545_p8, %p1539_p5 }
  0x16   :  { %1549 = shalt.err (!%p1546_p9)
}
  0x17   :  { %24 = dma.hbm_to_vmem [thread:$0]  %s1969_s0, 512, %s19_s18, [#allocation6], %s1620_s20, %s1620_s20, %s1621_s21  }
  0x18   :  { %s1622_s27 = smov [#allocation10]   ;;  %s1623_s29 = smov [#allocation11]  }
  0x19   :  { %s42_s28 = sshll.u32 %s1622_s27, 4  ;;  %s54_s30 = sshll.u32 %s1623_s29, 4  ;;  %s43_s28 = int_to_ptr.vmem [resolvable:$true] %s42_s28  ;;  %s55_s30 = int_to_ptr.vmem [resolvable:$true] %s54_s30 }
  0x1a   :  { %s1558_s5 = scalar_lea.vmem %s43_s28, 512  ;;  %p1563_p11 = scmp.lt.s32.totalorder %s43_s28, %s43_s28 }
  0x1b   :  { %p1559_p10 = scmp.ne.s32.totalorder %s43_s28, %s1558_s5  ;;  %p1564_p12 = scmp.lt.s32.totalorder %s1558_s5, %s1558_s5 }
  0x1d   :  { %p1565_p13 = por %p1564_p12, %p1563_p11 }
  0x1f   :  { %p1566_p0 = pnand %p1565_p13, %p1559_p10 }
  0x21   :  { %1569 = shalt.err (!%p1566_p0)
}
  0x22   :  { %48 = dma.hbm_to_vmem [thread:$0]  %s1971_s2, 512, %s43_s28, [#allocation9], %s1620_s20, %s1620_s20, %s1621_s21  }
  0x23   :  { %s1578_s7 = scalar_lea.vmem %s55_s30, 256  ;;  %p1583_p2 = scmp.lt.s32.totalorder %s55_s30, %s55_s30 }
  0x24   :  { %p1579_p1 = scmp.ne.s32.totalorder %s55_s30, %s1578_s7  ;;  %p1584_p3 = scmp.lt.s32.totalorder %s1578_s7, %s1578_s7 }
  0x26   :  { %p1585_p4 = por %p1584_p3, %p1583_p2 }
  0x28   :  { %p1586_p5 = pnand %p1585_p4, %p1579_p1 }
  0x2a   :  { %1589 = shalt.err (!%p1586_p5)
}
  0x2b   :  { %s1624_s0 = smov 32   ;;  %s1625_s8 = smov 2  }
  0x2c   :  { %60 = dma.hbm_to_vmem [thread:$0]  %s1972_s3, 256, %s55_s30, [#allocation12], %s1624_s0, %s1624_s0, %s1625_s8  }
  0x2d   :  { %1610 = dma.done.wait [#allocation6], 512  }
  0x2e   :  { %1611 = vsyncadd [#allocation6], 4294966784 }
  0x2f   :  { %1612 = dma.done.wait [#allocation9], 1024  }
  0x30   :  { %1613 = vsyncadd [#allocation9], 4294966272 }
  0x31   :  { %1614 = dma.done.wait [#allocation12], 256  }
  0x32   :  { %1615 = vsyncadd [#allocation12], 4294967040  ;;  %vm95_vm0 = vcmask 261120   ;;  %v1626_v0 = vmov 0.0   ;;  %vm1627_vm1 = vmmov 0   ;;  %vm78_vm2 = vcmask 7168  }
  0x33   :  { %1346 = vmatprep.subr.bf16.mxu0 %v1626_v0  ;;  %1352 = vmatprep.subr.bf16.mxu1 %v1626_v0  ;;  %96 = vst.msk [vmem:[#allocation4] sm:$0xff] %vm95_vm0, %v1626_v0  ;;  %97 = vst.msk [vmem:[#allocation4 + $0x8] sm:$0xff] %vm95_vm0, %v1626_v0  ;;  %v112_v1 = vld [vmem:[#allocation8] sm:$0xf]  ;;  %v113_v2 = vld [vmem:[#allocation8 + $0x4] sm:$0xf] }
  0x34   :  { %98 = vst.msk [vmem:[#allocation4 + $0x10] sm:$0xff] %vm95_vm0, %v1626_v0  ;;  %99 = vst.msk [vmem:[#allocation4 + $0x18] sm:$0xff] %vm95_vm0, %v1626_v0  ;;  %1348 = vmatprep.mubr.msk.bf16.mxu0 %vm1627_vm1, %v1626_v0  ;;  %1354 = vmatprep.mubr.msk.bf16.mxu1 %vm1627_vm1, %v1626_v0  ;;  %v133_v3 = vsel %vm95_vm0, %v112_v1, 0  ;;  %v179_v4 = vsel %vm95_vm0, %v113_v2, 0  ;;  %v114_v5 = vld [vmem:[#allocation8 + $0x8] sm:$0xf] }
  0x35   :  { %100 = vst.msk [vmem:[#allocation4 + $0x20] sm:$0xff] %vm95_vm0, %v1626_v0  ;;  %101 = vst.msk [vmem:[#allocation4 + $0x28] sm:$0xff] %vm95_vm0, %v1626_v0  ;;  %1347 = vmatpush3.bf16.xpose.msra.mxu0 %v133_v3  ;;  %1353 = vmatpush3.bf16.xpose.msra.mxu1 %v179_v4  ;;  %v115_v6 = vld [vmem:[#allocation8 + $0xc] sm:$0xf]  ;;  %v104_v7 = vld [vmem:[#allocation5] sm:$0xf] }
  0x36   :  { %102 = vst.msk [vmem:[#allocation4 + $0x30] sm:$0xff] %vm95_vm0, %v1626_v0  ;;  %103 = vst.msk [vmem:[#allocation4 + $0x38] sm:$0xff] %vm95_vm0, %v1626_v0  ;;  %1358 = vmatprep.subr.bf16.mxu0 %v1626_v0  ;;  %1364 = vmatprep.subr.bf16.mxu1 %v1626_v0  ;;  %v105_v8 = vld [vmem:[#allocation5 + $0x4] sm:$0xf]  ;;  %v225_v9 = vsel %vm95_vm0, %v114_v5, 0  ;;  %v271_v10 = vsel %vm95_vm0, %v115_v6, 0 }
  0x37   :  { %v116_v11 = vld [vmem:[#allocation8 + $0x10] sm:$0xf]  ;;  %v117_v12 = vld [vmem:[#allocation8 + $0x14] sm:$0xf]  ;;  %v106_v13 = vld [vmem:[#allocation5 + $0x8] sm:$0xf] }
  0x38   :  { %v107_v14 = vld [vmem:[#allocation5 + $0xc] sm:$0xf]  ;;  %v317_v15 = vsel %vm95_vm0, %v116_v11, 0  ;;  %v363_v16 = vsel %vm95_vm0, %v117_v12, 0  ;;  %v118_v17 = vld [vmem:[#allocation8 + $0x18] sm:$0xf] }
  0x39   :  { %v119_v18 = vld [vmem:[#allocation8 + $0x1c] sm:$0xf]  ;;  %v108_v19 = vld [vmem:[#allocation5 + $0x10] sm:$0xf]  ;;  %v109_v20 = vld [vmem:[#allocation5 + $0x14] sm:$0xf] }
  0x3a   :  { %v409_v21 = vsel %vm95_vm0, %v118_v17, 0  ;;  %v455_v22 = vsel %vm95_vm0, %v119_v18, 0  ;;  %v110_v23 = vld [vmem:[#allocation5 + $0x18] sm:$0xf]  ;;  %v111_v24 = vld [vmem:[#allocation5 + $0x1c] sm:$0xf] }
  0x3b   :  { %v1628_v25 = vmov -inf   ;;  %87 = vst.msk [vmem:[#allocation3] sm:$0xff] %vm78_vm2, %v1626_v0  ;;  %88 = vst.msk [vmem:[#allocation3 + $0x8] sm:$0xff] %vm78_vm2, %v1626_v0  ;;  %v1299_v26 = vld [vmem:[#allocation11] sm:$0xff]   ;;  %vm545_vm5 = vcmask 64512   ;;  %v1443_v42 = vld [vmem:[#allocation11 + $0x8] sm:$0xff]  }
  0x3c   :  { %1349 = vmatmul.mubr.msk.bf16.vlgmr.msra.gmra.mxu0 %vm95_vm0, %v104_v7  ;;  %1355 = vmatmul.mubr.msk.bf16.vlgmr.msra.gmra.mxu1 %vm95_vm0, %v105_v8  ;;  %79 = vst.msk [vmem:[#allocation2] sm:$0xff] %vm78_vm2, %v1628_v25  ;;  %80 = vst.msk [vmem:[#allocation2 + $0x8] sm:$0xff] %vm78_vm2, %v1628_v25  ;;  %v1300_v27 = vunpack.c.0.s8 %v1299_v26  ;;  %v1301_v28 = vunpack.c.1.s8 %v1299_v26  ;;  %v1304_v31 = vunpack.c.2.s8 %v1299_v26  ;;  %v1305_v32 = vunpack.c.3.s8 %v1299_v26  ;;  %s1630_s2 = smov [#allocation13]  }
  0x3d   :  { %1359 = vmatpush3.bf16.xpose.msra.mxu0 %v225_v9  ;;  %1365 = vmatpush3.bf16.xpose.msra.mxu1 %v271_v10  ;;  %81 = vst.msk [vmem:[#allocation2 + $0x10] sm:$0xff] %vm78_vm2, %v1628_v25  ;;  %82 = vst.msk [vmem:[#allocation2 + $0x18] sm:$0xff] %vm78_vm2, %v1628_v25  ;;  %v1308_v48 = vunpack.c.0.s8 %v1443_v42  ;;  %v1309_v49 = vunpack.c.1.s8 %v1443_v42  ;;  %v1312_v1 = vunpack.c.2.s8 %v1443_v42  ;;  %v1313_v2 = vunpack.c.3.s8 %v1443_v42  ;;  %s1268_s3 = sshll.u32 %s1630_s2, 4  ;;  %s1269_s3 = int_to_ptr.vmem [resolvable:$true] %s1268_s3 }
  0x3e   :  { %1360 = vmatprep.mubr.msk.bf16.mxu0 %vm1627_vm1, %v1626_v0  ;;  %1366 = vmatprep.mubr.msk.bf16.mxu1 %vm1627_vm1, %v1626_v0  ;;  %83 = vst.msk [vmem:[#allocation2 + $0x20] sm:$0xff] %vm78_vm2, %v1628_v25  ;;  %84 = vst.msk [vmem:[#allocation2 + $0x28] sm:$0xff] %vm78_vm2, %v1628_v25  ;;  %v513_v29 = vcvt.s32.f32 %v1300_v27  ;;  %v514_v30 = vcvt.s32.f32 %v1301_v28  ;;  %v515_v40 = vcvt.s32.f32 %v1304_v31  ;;  %v516_v41 = vcvt.s32.f32 %v1305_v32  ;;  %s1590_s11 = scalar_lea.vmem %s1269_s3, 1024  ;;  %p1595_p7 = scmp.lt.s32.totalorder %s1269_s3, %s1269_s3 }
  0x3f   :  { %1370 = vmatprep.subr.bf16.mxu0 %v1626_v0  ;;  %1376 = vmatprep.subr.bf16.mxu1 %v1626_v0  ;;  %85 = vst.msk [vmem:[#allocation2 + $0x30] sm:$0xff] %vm78_vm2, %v1628_v25  ;;  %86 = vst.msk [vmem:[#allocation2 + $0x38] sm:$0xff] %vm78_vm2, %v1628_v25  ;;  %v517_v57 = vcvt.s32.f32 %v1308_v48  ;;  %v518_v58 = vcvt.s32.f32 %v1309_v49  ;;  %v1629_v3 = vmov 0   ;;  %v519_v12 = vcvt.s32.f32 %v1312_v1  ;;  %v120_v49 = vld [vmem:[#allocation10] sm:$0xf]  ;;  %p1591_p6 = scmp.ne.s32.totalorder %s1269_s3, %s1590_s11  ;;  %p1596_p8 = scmp.lt.s32.totalorder %s1590_s11, %s1590_s11 }
  0x40   :  { %89 = vst.msk [vmem:[#allocation3 + $0x10] sm:$0xff] %vm78_vm2, %v1626_v0  ;;  %90 = vst.msk [vmem:[#allocation3 + $0x18] sm:$0xff] %vm78_vm2, %v1626_v0  ;;  %vm521_vm3 = vcmp.ne.f32.partialorder %v513_v29, 0.0  ;;  %vm522_vm4 = vcmp.ne.f32.partialorder %v514_v30, 0.0  ;;  %vm523_vm6 = vcmp.ne.f32.partialorder %v515_v40, 0.0  ;;  %vm524_vm7 = vcmp.ne.f32.partialorder %v516_v41, 0.0  ;;  %1460 = vset.pattern.permute.xlu0 %v1629_v3  ;;  %1461 = vset.pattern.permute.xlu1 %v1629_v3 }
  0x41   :  { %91 = vst.msk [vmem:[#allocation3 + $0x20] sm:$0xff] %vm78_vm2, %v1626_v0  ;;  %92 = vst.msk [vmem:[#allocation3 + $0x28] sm:$0xff] %vm78_vm2, %v1626_v0  ;;  %vm525_vm8 = vcmp.ne.f32.partialorder %v517_v57, 0.0  ;;  %vm526_vm9 = vcmp.ne.f32.partialorder %v518_v58, 0.0  ;;  %vm527_vm10 = vcmp.ne.f32.partialorder %v519_v12, 0.0  ;;  %vm734_vm12 = vcmask 1043456   ;;  %p1597_p9 = por %p1596_p8, %p1595_p7 }
  0x42   :  { %93 = vst.msk [vmem:[#allocation3 + $0x30] sm:$0xff] %vm78_vm2, %v1626_v0  ;;  %94 = vst.msk [vmem:[#allocation3 + $0x38] sm:$0xff] %vm78_vm2, %v1626_v0  ;;  %v121_v58 = vld [vmem:[#allocation10 + $0x4] sm:$0xf] }
  0x43   :  { %v1788_v30 = vld [vmem:[#allocation2] sm:$0xff]  ;;  %p1598_p10 = pnand %p1597_p9, %p1591_p6 }
  0x44   :  { %1361 = vmatmul.mubr.msk.bf16.vlgmr.msra.gmra.mxu0 %vm95_vm0, %v106_v13  ;;  %1367 = vmatmul.mubr.msk.bf16.vlgmr.msra.gmra.mxu1 %vm95_vm0, %v107_v14  ;;  %v520_v13 = vcvt.s32.f32 %v1313_v2 }
  0x45   :  { %1371 = vmatpush3.bf16.xpose.msra.mxu0 %v317_v15  ;;  %1377 = vmatpush3.bf16.xpose.msra.mxu1 %v363_v16  ;;  %v1825_v48 = vld [vmem:[#allocation2 + $0x28] sm:$0xff] }
  0x46   :  { %1372 = vmatprep.mubr.msk.bf16.mxu0 %vm1627_vm1, %v1626_v0  ;;  %1378 = vmatprep.mubr.msk.bf16.mxu1 %vm1627_vm1, %v1626_v0  ;;  %vm528_vm11 = vcmp.ne.f32.partialorder %v520_v13, 0.0 }
  0x47   :  { %1382 = vmatprep.subr.bf16.mxu0 %v1626_v0  ;;  %1388 = vmatprep.subr.bf16.mxu1 %v1626_v0 }
  0x4c   :  { %1373 = vmatmul.mubr.msk.bf16.vlgmr.msra.gmra.mxu0 %vm95_vm0, %v108_v19  ;;  %1379 = vmatmul.mubr.msk.bf16.vlgmr.msra.gmra.mxu1 %vm95_vm0, %v109_v20 }
  0x4d   :  { %1383 = vmatpush3.bf16.xpose.msra.mxu0 %v409_v21  ;;  %1389 = vmatpush3.bf16.xpose.msra.mxu1 %v455_v22 }
  0x4e   :  { %1384 = vmatprep.mubr.msk.bf16.mxu0 %vm1627_vm1, %v1626_v0  ;;  %1390 = vmatprep.mubr.msk.bf16.mxu1 %vm1627_vm1, %v1626_v0 }
  0x4f   :  { %1394 = vmatprep.subr.bf16.mxu0 %v1626_v0  ;;  %1400 = vmatprep.subr.bf16.mxu1 %v1626_v0 }
  0x54   :  { %1385 = vmatmul.mubr.msk.bf16.vlgmr.msra.gmra.mxu0 %vm95_vm0, %v110_v23  ;;  %1391 = vmatmul.mubr.msk.bf16.vlgmr.msra.gmra.mxu1 %vm95_vm0, %v111_v24 }
  0x55   :  { %1396 = vmatprep.mubr.msk.bf16.mxu0 %vm1627_vm1, %v1626_v0  ;;  %1402 = vmatprep.mubr.msk.bf16.mxu1 %vm1627_vm1, %v1626_v0 }
  0xfc   :  { %v169_v33 = vpop.f32.mrf.mxu0  ;;  %v215_v34 = vpop.f32.mrf.mxu1 }
  0xfd   :  { %v1756_v35 = vsel %vm521_vm3, -1e+09, %v169_v33  ;;  %v1758_v36 = vsel %vm522_vm4, -1e+09, %v215_v34  ;;  %v1793_v33 = vld [vmem:[#allocation2 + $0x8] sm:$0xff] }
  0xfe   :  { %v1350_v37 = vpop.f32.mrf.mxu0  ;;  %v1356_v38 = vpop.f32.mrf.mxu1  ;;  %v546_v39 = vsel %vm545_vm5, %v1756_v35, -inf  ;;  %v549_v45 = vsel %vm545_vm5, %v1758_v36, -inf }
  0xff   :  { %547 = vmax.xlane.f32.xlu0 %v546_v39  ;;  %v1803_v39 = vld [vmem:[#allocation2 + $0x10] sm:$0xff] }
 0x100   :  { %v172_v43 = vpop.f32.mrf.mxu0  ;;  %v218_v44 = vpop.f32.mrf.mxu1 }
 0x101   :  { %v1813_v43 = vld [vmem:[#allocation2 + $0x18] sm:$0xff] }
 0x102   :  { %v1351_v46 = vpop.f32.mrf.mxu0  ;;  %v1357_v47 = vpop.f32.mrf.mxu1 }
 0x103   :  { %550 = vmax.xlane.f32.xlu0 %v549_v45  ;;  %v1823_v47 = vld [vmem:[#allocation2 + $0x20] sm:$0xff] }
 0x104   :  { %v261_v50 = vpop.f32.mrf.mxu0  ;;  %v307_v51 = vpop.f32.mrf.mxu1 }
 0x105   :  { %v1764_v52 = vsel %vm523_vm6, -1e+09, %v261_v50  ;;  %v1766_v53 = vsel %vm524_vm7, -1e+09, %v307_v51  ;;  %v736_v51 = vsel %vm734_vm12, %v120_v49, 0 }
 0x106   :  { %v1362_v54 = vpop.f32.mrf.mxu0  ;;  %v1368_v55 = vpop.f32.mrf.mxu1  ;;  %v552_v56 = vsel %vm545_vm5, %v1764_v52, -inf  ;;  %v555_v61 = vsel %vm545_vm5, %v1766_v53, -inf  ;;  %1395 = vmatpush3.bf16.msra.mxu0 %v736_v51  ;;  %v124_v51 = vld [vmem:[#allocation10 + $0x10] sm:$0xf] }
 0x107   :  { %553 = vmax.xlane.f32.xlu1 %v552_v56  ;;  %1406 = vmatprep.subr.bf16.mxu0 %v1626_v0 }
 0x108   :  { %v264_v59 = vpop.f32.mrf.mxu0  ;;  %v310_v60 = vpop.f32.mrf.mxu1 }
 0x10a   :  { %v1363_v62 = vpop.f32.mrf.mxu0  ;;  %v1369_v63 = vpop.f32.mrf.mxu1 }
 0x10b   :  { %556 = vmax.xlane.f32.xlu1 %v555_v61  ;;  %v782_v61 = vsel %vm734_vm12, %v121_v58, 0  ;;  %v1851_v62 = vld [vmem:[#allocation2 + $0x30] sm:$0xff]  ;;  %v1853_v63 = vld [vmem:[#allocation2 + $0x38] sm:$0xff] }
 0x10c   :  { %v353_v4 = vpop.f32.mrf.mxu0  ;;  %v399_v5 = vpop.f32.mrf.mxu1  ;;  %1401 = vmatpush3.bf16.msra.mxu1 %v782_v61 }
 0x10d   :  { %v1772_v6 = vsel %vm525_vm8, -1e+09, %v353_v4  ;;  %v1774_v7 = vsel %vm526_vm9, -1e+09, %v399_v5  ;;  %1412 = vmatprep.subr.bf16.mxu1 %v1626_v0 }
 0x10e   :  { %v1374_v8 = vpop.f32.mrf.mxu0  ;;  %v1380_v9 = vpop.f32.mrf.mxu1  ;;  %v558_v10 = vsel %vm545_vm5, %v1772_v6, -inf  ;;  %v561_v11 = vsel %vm545_vm5, %v1774_v7, -inf }
 0x10f   :  { %559 = vmax.xlane.f32.xlu0 %v558_v10  ;;  %562 = vmax.xlane.f32.xlu1 %v561_v11 }
 0x110   :  { %v356_v14 = vpop.f32.mrf.mxu0  ;;  %v402_v15 = vpop.f32.mrf.mxu1 }
 0x112   :  { %v1375_v16 = vpop.f32.mrf.mxu0  ;;  %v1381_v17 = vpop.f32.mrf.mxu1 }
 0x114   :  { %v445_v18 = vpop.f32.mrf.mxu0  ;;  %v491_v19 = vpop.f32.mrf.mxu1 }
 0x115   :  { %v1780_v20 = vsel %vm527_vm10, -1e+09, %v445_v18  ;;  %v1782_v21 = vsel %vm528_vm11, -1e+09, %v491_v19 }
 0x116   :  { %v1386_v22 = vpop.f32.mrf.mxu0  ;;  %v1392_v23 = vpop.f32.mrf.mxu1  ;;  %v564_v24 = vsel %vm545_vm5, %v1780_v20, -inf  ;;  %v567_v25 = vsel %vm545_vm5, %v1782_v21, -inf }
 0x117   :  { %565 = vmax.xlane.f32.xlu0 %v564_v24  ;;  %568 = vmax.xlane.f32.xlu1 %v567_v25  ;;  %v122_v24 = vld [vmem:[#allocation10 + $0x8] sm:$0xf] }
 0x118   :  { %v448_v26 = vpop.f32.mrf.mxu0  ;;  %v494_v27 = vpop.f32.mrf.mxu1 }
 0x11a   :  { %v1387_v28 = vpop.f32.mrf.mxu0  ;;  %v1393_v29 = vpop.f32.mrf.mxu1 }
 0x11b   :  { %v828_v28 = vsel %vm734_vm12, %v122_v24, 0 }
 0x188   :  { %v548_v31 = vpop.xlane.xlu0 %547 }
 0x189   :  { %v1791_v32 = vmax.f32 %v1788_v30, %v548_v31 }
 0x18b   :  { %v578_v34 = vsub.f32 %v1788_v30, %v1791_v32  ;;  %1172 = vst.msk [vmem:[#allocation2] sm:$0xff] %vm78_vm2, %v1791_v32  ;;  %604 = vperm.xlu0 %1460, %v1791_v32  }
 0x18c   :  { %v551_v37 = vpop.xlane.xlu0 %550 }
 0x18d   :  { %v1801_v38 = vmax.f32 %v1793_v33, %v551_v37 }
 0x18f   :  { %v579_v40 = vsub.f32 %v1793_v33, %v1801_v38  ;;  %1173 = vst.msk [vmem:[#allocation2 + $0x8] sm:$0xff] %vm78_vm2, %v1801_v38  ;;  %609 = vperm.xlu1 %1461, %v1801_v38  }
 0x190   :  { %v554_v41 = vpop.xlane.xlu1 %553 }
 0x191   :  { %v1811_v42 = vmax.f32 %v1803_v39, %v554_v41 }
 0x193   :  { %v580_v44 = vsub.f32 %v1803_v39, %v1811_v42  ;;  %1174 = vst.msk [vmem:[#allocation2 + $0x10] sm:$0xff] %vm78_vm2, %v1811_v42  ;;  %614 = vperm.xlu1 %1461, %v1811_v42  }
 0x194   :  { %v557_v45 = vpop.xlane.xlu1 %556 }
 0x195   :  { %v1821_v46 = vmax.f32 %v1813_v43, %v557_v45 }
 0x197   :  { %v581_v50 = vsub.f32 %v1813_v43, %v1821_v46  ;;  %1175 = vst.msk [vmem:[#allocation2 + $0x18] sm:$0xff] %vm78_vm2, %v1821_v46  ;;  %619 = vperm.xlu1 %1461, %v1821_v46  }
 0x198   :  { %v560_v54 = vpop.xlane.xlu0 %559  ;;  %v563_v55 = vpop.xlane.xlu1 %562 }
 0x199   :  { %v1834_v56 = vmax.f32 %v1823_v47, %v560_v54  ;;  %v1837_v57 = vmax.f32 %v1825_v48, %v563_v55  ;;  %v592_v33 = vmul.f32 1.442695, %v581_v50  ;;  %v666_v50 = vld [vmem:[#allocation3] sm:$0xff] }
 0x19b   :  { %v582_v59 = vsub.f32 %v1823_v47, %v1834_v56  ;;  %1176 = vst.msk [vmem:[#allocation2 + $0x20] sm:$0xff] %vm78_vm2, %v1834_v56  ;;  %624 = vperm.xlu1 %1461, %v1834_v56   ;;  %v583_v60 = vsub.f32 %v1825_v48, %v1837_v57  ;;  %1177 = vst.msk [vmem:[#allocation2 + $0x28] sm:$0xff] %vm78_vm2, %v1837_v57 }
 0x19d   :  { %v594_v38 = vmul.f32 1.442695, %v582_v59  ;;  %v596_v30 = vmul.f32 1.442695, %v583_v60  ;;  %v667_v59 = vld [vmem:[#allocation3 + $0x8] sm:$0xff] }
 0x19f   :  { %629 = vperm.xlu1 %1461, %v1837_v57  }
 0x1a0   :  { %v566_v1 = vpop.xlane.xlu0 %565  ;;  %v569_v2 = vpop.xlane.xlu1 %568 }
 0x1a1   :  { %v1857_v3 = vmax.f32 %v1851_v62, %v566_v1  ;;  %v1860_v4 = vmax.f32 %v1853_v63, %v569_v2  ;;  %v920_v1 = vsel %vm734_vm12, %v124_v51, 0 }
 0x1a3   :  { %v584_v5 = vsub.f32 %v1851_v62, %v1857_v3  ;;  %1178 = vst.msk [vmem:[#allocation2 + $0x30] sm:$0xff] %vm78_vm2, %v1857_v3  ;;  %634 = vperm.xlu1 %1461, %v1857_v3   ;;  %v585_v8 = vsub.f32 %v1853_v63, %v1860_v4  ;;  %1179 = vst.msk [vmem:[#allocation2 + $0x38] sm:$0xff] %vm78_vm2, %v1860_v4  ;;  %v668_v3 = vld [vmem:[#allocation3 + $0x10] sm:$0xff] }
 0x1a5   :  { %v598_v32 = vmul.f32 1.442695, %v584_v5 }
 0x1a7   :  { %639 = vperm.xlu1 %1461, %v1860_v4  }
 0x206   :  { %v605_v9 = vpop.permute.xlu0 %604 }
 0x207   :  { %v642_v10 = vsub.f32 %v1756_v35, %v605_v9  ;;  %v125_v9 = vld [vmem:[#allocation10 + $0x14] sm:$0xf] }
 0x209   :  { %v650_v11 = vmul.f32 1.442695, %v642_v10 }
 0x20a   :  { %v610_v12 = vpop.permute.xlu1 %609 }
 0x20b   :  { %1462 = vpow2.f32 %v650_v11  ;;  %v643_v13 = vsub.f32 %v1758_v36, %v610_v12 }
 0x20d   :  { %v652_v14 = vmul.f32 1.442695, %v643_v13 }
 0x20e   :  { %v615_v15 = vpop.permute.xlu1 %614 }
 0x20f   :  { %1464 = vpow2.f32 %v652_v14  ;;  %v644_v16 = vsub.f32 %v1764_v52, %v615_v15  ;;  %v123_v52 = vld [vmem:[#allocation10 + $0xc] sm:$0xf]  ;;  %v966_v14 = vsel %vm734_vm12, %v125_v9, 0  ;;  %v126_v15 = vld [vmem:[#allocation10 + $0x18] sm:$0xf] }
 0x210   :  { %v874_v45 = vsel %vm734_vm12, %v123_v52, 0 }
 0x211   :  { %v654_v17 = vmul.f32 1.442695, %v644_v16 }
 0x212   :  { %v620_v18 = vpop.permute.xlu1 %619 }
 0x213   :  { %1466 = vpow2.f32 %v654_v17  ;;  %v645_v19 = vsub.f32 %v1766_v53, %v620_v18  ;;  %v1012_v18 = vsel %vm734_vm12, %v126_v15, 0  ;;  %v673_v15 = vld [vmem:[#allocation3 + $0x38] sm:$0xff] }
 0x215   :  { %v656_v22 = vmul.f32 1.442695, %v645_v19  ;;  %v127_v19 = vld [vmem:[#allocation10 + $0x1c] sm:$0xf] }
 0x216   :  { %v625_v23 = vpop.permute.xlu1 %624 }
 0x217   :  { %1468 = vpow2.f32 %v656_v22  ;;  %v646_v35 = vsub.f32 %v1772_v6, %v625_v23 }
 0x218   :  { %v1463_v25 = vpop.eup %1462 }
 0x219   :  { %v658_v26 = vmul.f32 1.442695, %v646_v35  ;;  %v682_v36 = vsel %vm545_vm5, %v1463_v25, 0.0  ;;  %v723_v27 = vpack.c.bf16 %v1463_v25, %v1463_v25  ;;  %v1058_v35 = vsel %vm734_vm12, %v127_v19, 0 }
 0x21a   :  { %v630_v29 = vpop.permute.xlu1 %629  ;;  %683 = vadd.xlane.f32.xlu1 %v682_v36 }
 0x21b   :  { %1470 = vpow2.f32 %v658_v26  ;;  %v647_v31 = vsub.f32 %v1774_v7, %v630_v29  ;;  %1397 = vmatmul.mubr.msk.bf16.vlgmr.msra.gmra.mxu0 %vm545_vm5, %v723_v27 }
 0x21c   :  { %v1465_v53 = vpop.eup %1464  ;;  %1407 = vmatpush3.bf16.msra.mxu0 %v828_v28  ;;  %1408 = vmatprep.mubr.msk.bf16.mxu0 %vm1627_vm1, %v1626_v0  ;;  %v588_v28 = vmul.f32 1.442695, %v579_v40 }
 0x21d   :  { %v660_v6 = vmul.f32 1.442695, %v647_v31  ;;  %v685_v37 = vsel %vm545_vm5, %v1465_v53, 0.0  ;;  %v724_v41 = vpack.c.bf16 %v1465_v53, %v1465_v53  ;;  %1418 = vmatprep.subr.bf16.mxu0 %v1626_v0  ;;  %v586_v31 = vmul.f32 1.442695, %v578_v34  ;;  %v669_v53 = vld [vmem:[#allocation3 + $0x18] sm:$0xff] }
 0x21e   :  { %v635_v49 = vpop.permute.xlu1 %634  ;;  %686 = vadd.xlane.f32.xlu0 %v685_v37  ;;  %v600_v34 = vmul.f32 1.442695, %v585_v8 }
 0x21f   :  { %1472 = vpow2.f32 %v660_v6  ;;  %v648_v7 = vsub.f32 %v1780_v20, %v635_v49  ;;  %1403 = vmatmul.mubr.msk.bf16.vlgmr.msra.gmra.mxu1 %vm545_vm5, %v724_v41  ;;  %v670_v49 = vld [vmem:[#allocation3 + $0x20] sm:$0xff] }
 0x220   :  { %v1467_v54 = vpop.eup %1466  ;;  %1413 = vmatpush3.bf16.msra.mxu1 %v874_v45  ;;  %1414 = vmatprep.mubr.msk.bf16.mxu1 %vm1627_vm1, %v1626_v0 }
 0x221   :  { %v662_v55 = vmul.f32 1.442695, %v648_v7  ;;  %v688_v58 = vsel %vm545_vm5, %v1467_v54, 0.0  ;;  %v725_v61 = vpack.c.bf16 %v1467_v54, %v1467_v54  ;;  %1424 = vmatprep.subr.bf16.mxu1 %v1626_v0 }
 0x222   :  { %v640_v2 = vpop.permute.xlu1 %639  ;;  %689 = vadd.xlane.f32.xlu0 %v688_v58  ;;  %v671_v58 = vld [vmem:[#allocation3 + $0x28] sm:$0xff] }
 0x223   :  { %1474 = vpow2.f32 %v662_v55  ;;  %v649_v20 = vsub.f32 %v1782_v21, %v640_v2  ;;  %1409 = vmatmul.mubr.msk.bf16.vlgmr.msra.gmra.mxu0 %vm545_vm5, %v725_v61 }
 0x224   :  { %v1469_v10 = vpop.eup %1468  ;;  %1419 = vmatpush3.bf16.msra.mxu0 %v920_v1  ;;  %1420 = vmatprep.mubr.msk.bf16.mxu0 %vm1627_vm1, %v1626_v0 }
 0x225   :  { %v664_v11 = vmul.f32 1.442695, %v649_v20  ;;  %v691_v12 = vsel %vm545_vm5, %v1469_v10, 0.0  ;;  %v726_v13 = vpack.c.bf16 %v1469_v10, %v1469_v10  ;;  %1430 = vmatprep.subr.bf16.mxu0 %v1626_v0  ;;  %v672_v20 = vld [vmem:[#allocation3 + $0x30] sm:$0xff] }
 0x226   :  { %692 = vadd.xlane.f32.xlu1 %v691_v12 }
 0x227   :  { %1476 = vpow2.f32 %v664_v11  ;;  %1415 = vmatmul.mubr.msk.bf16.vlgmr.msra.gmra.mxu1 %vm545_vm5, %v726_v13 }
 0x228   :  { %v1471_v21 = vpop.eup %1470  ;;  %1425 = vmatpush3.bf16.msra.mxu1 %v966_v14  ;;  %1426 = vmatprep.mubr.msk.bf16.mxu1 %vm1627_vm1, %v1626_v0  ;;  %1478 = vpow2.f32 %v588_v28 }
 0x229   :  { %v694_v16 = vsel %vm545_vm5, %v1471_v21, 0.0  ;;  %v727_v17 = vpack.c.bf16 %v1471_v21, %v1471_v21  ;;  %1436 = vmatprep.subr.bf16.mxu1 %v1626_v0  ;;  %1480 = vpow2.f32 %v586_v31 }
 0x22a   :  { %695 = vadd.xlane.f32.xlu0 %v694_v16 }
 0x22b   :  { %1421 = vmatmul.mubr.msk.bf16.vlgmr.msra.gmra.mxu0 %vm545_vm5, %v727_v17 }
 0x22c   :  { %v1473_v22 = vpop.eup %1472  ;;  %1431 = vmatpush3.bf16.msra.mxu0 %v1012_v18  ;;  %1432 = vmatprep.mubr.msk.bf16.mxu0 %vm1627_vm1, %v1626_v0 }
 0x22d   :  { %v697_v23 = vsel %vm545_vm5, %v1473_v22, 0.0  ;;  %v728_v24 = vpack.c.bf16 %v1473_v22, %v1473_v22 }
 0x22e   :  { %698 = vadd.xlane.f32.xlu1 %v697_v23 }
 0x22f   :  { %1427 = vmatmul.mubr.msk.bf16.vlgmr.msra.gmra.mxu1 %vm545_vm5, %v728_v24 }
 0x230   :  { %v1475_v25 = vpop.eup %1474  ;;  %1437 = vmatpush3.bf16.msra.mxu1 %v1058_v35  ;;  %1438 = vmatprep.mubr.msk.bf16.mxu1 %vm1627_vm1, %v1626_v0  ;;  %v590_v0 = vmul.f32 1.442695, %v580_v44 }
 0x231   :  { %v700_v26 = vsel %vm545_vm5, %v1475_v25, 0.0  ;;  %v729_v36 = vpack.c.bf16 %v1475_v25, %v1475_v25 }
 0x232   :  { %701 = vadd.xlane.f32.xlu0 %v700_v26  ;;  %1482 = vpow2.f32 %v590_v0 }
 0x233   :  { %1433 = vmatmul.mubr.msk.bf16.vlgmr.msra.gmra.mxu0 %vm545_vm5, %v729_v36  ;;  %1484 = vpow2.f32 %v592_v33 }
 0x234   :  { %v1477_v27 = vpop.eup %1476  ;;  %1486 = vpow2.f32 %v594_v38  ;;  %v1101_v38 = vld [vmem:[#allocation4 + $0x8] sm:$0xff] }
 0x235   :  { %v703_v29 = vsel %vm545_vm5, %v1477_v27, 0.0  ;;  %v730_v52 = vpack.c.bf16 %v1477_v27, %v1477_v27  ;;  %1488 = vpow2.f32 %v596_v30  ;;  %v1479_v39 = vpop.eup %1478 }
 0x236   :  { %704 = vadd.xlane.f32.xlu1 %v703_v29  ;;  %1490 = vpow2.f32 %v598_v32  ;;  %v1481_v40 = vpop.eup %1480  ;;  %v675_v62 = vmul.f32 %v1479_v39, %v667_v59 }
 0x237   :  { %1439 = vmatmul.mubr.msk.bf16.vlgmr.msra.gmra.mxu1 %vm545_vm5, %v730_v52  ;;  %1492 = vpow2.f32 %v600_v34  ;;  %v674_v56 = vmul.f32 %v1481_v40, %v666_v50  ;;  %v1100_v52 = vld [vmem:[#allocation4] sm:$0xff] }
 0x23f   :  { %v1483_v42 = vpop.eup %1482 }
 0x240   :  { %v1485_v43 = vpop.eup %1484  ;;  %v676_v5 = vmul.f32 %v1483_v42, %v668_v3 }
 0x241   :  { %v1487_v44 = vpop.eup %1486  ;;  %v677_v41 = vmul.f32 %v1485_v43, %v669_v53 }
 0x242   :  { %v1489_v46 = vpop.eup %1488  ;;  %v678_v54 = vmul.f32 %v1487_v44, %v670_v49 }
 0x243   :  { %v1491_v47 = vpop.eup %1490  ;;  %v679_v2 = vmul.f32 %v1489_v46, %v671_v58 }
 0x244   :  { %v1493_v48 = vpop.eup %1492  ;;  %v680_v12 = vmul.f32 %v1491_v47, %v672_v20  ;;  %v1106_v20 = vld [vmem:[#allocation4 + $0x30] sm:$0xff] }
 0x245   :  { %v681_v17 = vmul.f32 %v1493_v48, %v673_v15 }
 0x247   :  { %1115 = vperm.xlu1 %1461, %v1479_v39  }
 0x248   :  { %1110 = vperm.xlu0 %1460, %v1481_v40  }
 0x24b   :  { %1120 = vperm.xlu1 %1461, %v1483_v42   ;;  %v1102_v42 = vld [vmem:[#allocation4 + $0x10] sm:$0xff] }
 0x24c   :  { %1125 = vperm.xlu0 %1460, %v1485_v43  }
 0x24f   :  { %1130 = vperm.xlu1 %1461, %v1487_v44  }
 0x250   :  { %1135 = vperm.xlu0 %1460, %v1489_v46  }
 0x253   :  { %1140 = vperm.xlu1 %1461, %v1491_v47  }
 0x254   :  { %1145 = vperm.xlu0 %1460, %v1493_v48  }
 0x2a3   :  { %v684_v57 = vpop.xlane.xlu1 %683 }
 0x2a4   :  { %v706_v60 = vadd.f32 %v684_v57, %v674_v56  ;;  %v1103_v57 = vld [vmem:[#allocation4 + $0x18] sm:$0xff] }
 0x2a6   :  { %715 = vst.msk [vmem:[#allocation3] sm:$0xff] %vm78_vm2, %v706_v60 }
 0x2a7   :  { %v687_v63 = vpop.xlane.xlu0 %686 }
 0x2a8   :  { %v707_v4 = vadd.f32 %v687_v63, %v675_v62 }
 0x2aa   :  { %716 = vst.msk [vmem:[#allocation3 + $0x8] sm:$0xff] %vm78_vm2, %v707_v4 }
 0x2ab   :  { %v690_v8 = vpop.xlane.xlu0 %689 }
 0x2ac   :  { %v708_v6 = vadd.f32 %v690_v8, %v676_v5  ;;  %v1104_v8 = vld [vmem:[#allocation4 + $0x20] sm:$0xff] }
 0x2ad   :  { %v1183_v37 = vld [vmem:[#allocation3] sm:$0xff] }
 0x2ae   :  { %717 = vst.msk [vmem:[#allocation3 + $0x10] sm:$0xff] %vm78_vm2, %v708_v6  ;;  %1494 = vrcp.f32 %v1183_v37 }
 0x2af   :  { %v693_v45 = vpop.xlane.xlu1 %692 }
 0x2b0   :  { %v709_v51 = vadd.f32 %v693_v45, %v677_v41 }
 0x2b1   :  { %v1184_v7 = vld [vmem:[#allocation3 + $0x8] sm:$0xff] }
 0x2b2   :  { %718 = vst.msk [vmem:[#allocation3 + $0x18] sm:$0xff] %vm78_vm2, %v709_v51  ;;  %1496 = vrcp.f32 %v1184_v7  ;;  %v1105_v7 = vld [vmem:[#allocation4 + $0x28] sm:$0xff] }
 0x2b3   :  { %v696_v55 = vpop.xlane.xlu0 %695 }
 0x2b4   :  { %v710_v61 = vadd.f32 %v696_v55, %v678_v54 }
 0x2b5   :  { %v1185_v1 = vld [vmem:[#allocation3 + $0x10] sm:$0xff] }
 0x2b6   :  { %719 = vst.msk [vmem:[#allocation3 + $0x20] sm:$0xff] %vm78_vm2, %v710_v61  ;;  %1498 = vrcp.f32 %v1185_v1 }
 0x2b7   :  { %v699_v9 = vpop.xlane.xlu1 %698 }
 0x2b8   :  { %v711_v10 = vadd.f32 %v699_v9, %v679_v2 }
 0x2b9   :  { %v1186_v11 = vld [vmem:[#allocation3 + $0x18] sm:$0xff] }
 0x2ba   :  { %720 = vst.msk [vmem:[#allocation3 + $0x28] sm:$0xff] %vm78_vm2, %v711_v10  ;;  %1500 = vrcp.f32 %v1186_v11 }
 0x2bb   :  { %v1495_v13 = vpop.eup %1494  ;;  %v702_v14 = vpop.xlane.xlu0 %701 }
 0x2bc   :  { %v712_v21 = vadd.f32 %v702_v14, %v680_v12  ;;  %1209 = vperm.xlu1 %1461, %v1495_v13  }
 0x2bd   :  { %v1187_v16 = vld [vmem:[#allocation3 + $0x20] sm:$0xff] }
 0x2be   :  { %721 = vst.msk [vmem:[#allocation3 + $0x30] sm:$0xff] %vm78_vm2, %v712_v21  ;;  %1502 = vrcp.f32 %v1187_v16  ;;  %v1107_v16 = vld [vmem:[#allocation4 + $0x38] sm:$0xff] }
 0x2bf   :  { %v1497_v18 = vpop.eup %1496  ;;  %v705_v19 = vpop.xlane.xlu1 %704 }
 0x2c0   :  { %v713_v22 = vadd.f32 %v705_v19, %v681_v17  ;;  %1214 = vperm.xlu0 %1460, %v1497_v18  }
 0x2c1   :  { %v1188_v23 = vld [vmem:[#allocation3 + $0x28] sm:$0xff] }
 0x2c2   :  { %722 = vst.msk [vmem:[#allocation3 + $0x38] sm:$0xff] %vm78_vm2, %v713_v22  ;;  %1504 = vrcp.f32 %v1188_v23 }
 0x2c3   :  { %v1499_v24 = vpop.eup %1498  ;;  %v1111_v31 = vpop.permute.xlu0 %1110 }
 0x2c4   :  { %1219 = vperm.xlu1 %1461, %v1499_v24   ;;  %v1116_v0 = vpop.permute.xlu1 %1115  ;;  %v1148_v33 = vmul.f32 %v1111_v31, %v1100_v52 }
 0x2c5   :  { %v1189_v35 = vld [vmem:[#allocation3 + $0x30] sm:$0xff]  ;;  %v1149_v39 = vmul.f32 %v1116_v0, %v1101_v38 }
 0x2c6   :  { %1506 = vrcp.f32 %v1189_v35 }
 0x2c7   :  { %v1501_v25 = vpop.eup %1500  ;;  %v1126_v56 = vpop.permute.xlu0 %1125 }
 0x2c8   :  { %1224 = vperm.xlu0 %1460, %v1501_v25   ;;  %v1121_v40 = vpop.permute.xlu1 %1120  ;;  %v1151_v4 = vmul.f32 %v1126_v56, %v1103_v57 }
 0x2c9   :  { %v1190_v26 = vld [vmem:[#allocation3 + $0x38] sm:$0xff]  ;;  %v1150_v50 = vmul.f32 %v1121_v40, %v1102_v42 }
 0x2ca   :  { %1508 = vrcp.f32 %v1190_v26 }
 0x2cb   :  { %v1503_v36 = vpop.eup %1502  ;;  %v1136_v51 = vpop.permute.xlu0 %1135 }
 0x2cc   :  { %1229 = vperm.xlu1 %1461, %v1503_v36   ;;  %v1131_v5 = vpop.permute.xlu1 %1130  ;;  %v1153_v2 = vmul.f32 %v1136_v51, %v1105_v7 }
 0x2cd   :  { %v1152_v49 = vmul.f32 %v1131_v5, %v1104_v8 }
 0x2cf   :  { %v1505_v27 = vpop.eup %1504  ;;  %v1146_v21 = vpop.permute.xlu0 %1145 }
 0x2d0   :  { %1234 = vperm.xlu0 %1460, %v1505_v27   ;;  %v1141_v9 = vpop.permute.xlu1 %1140  ;;  %v1155_v24 = vmul.f32 %v1146_v21, %v1107_v16 }
 0x2d1   :  { %v1154_v15 = vmul.f32 %v1141_v9, %v1106_v20 }
 0x2d3   :  { %v1507_v28 = vpop.eup %1506 }
 0x2d4   :  { %1239 = vperm.xlu1 %1461, %v1507_v28  }
 0x2d7   :  { %v1509_v29 = vpop.eup %1508 }
 0x2d8   :  { %1244 = vperm.xlu0 %1460, %v1509_v29  }
 0x2db   :  { %v772_v30 = vpop.f32.mrf.mxu0 }
 0x2dc   :  { %v1156_v32 = vadd.f32 %v1148_v33, %v772_v30 }
 0x2dd   :  { %v1398_v34 = vpop.f32.mrf.mxu0 }
 0x2de   :  { %1164 = vst.msk [vmem:[#allocation4] sm:$0xff] %vm95_vm0, %v1156_v32 }
 0x2df   :  { %v775_v43 = vpop.f32.mrf.mxu0  ;;  %v818_v44 = vpop.f32.mrf.mxu1 }
 0x2e0   :  { %v1157_v46 = vadd.f32 %v1149_v39, %v818_v44 }
 0x2e1   :  { %v1399_v47 = vpop.f32.mrf.mxu0  ;;  %v1404_v48 = vpop.f32.mrf.mxu1 }
 0x2e2   :  { %1165 = vst.msk [vmem:[#allocation4 + $0x8] sm:$0xff] %vm95_vm0, %v1157_v46 }
 0x2e3   :  { %v821_v59 = vpop.f32.mrf.mxu1  ;;  %v864_v60 = vpop.f32.mrf.mxu0 }
 0x2e4   :  { %v1158_v62 = vadd.f32 %v1150_v50, %v864_v60 }
 0x2e5   :  { %v1405_v63 = vpop.f32.mrf.mxu1  ;;  %v1410_v3 = vpop.f32.mrf.mxu0  ;;  %v1199_v52 = vld [vmem:[#allocation4] sm:$0xff] }
 0x2e6   :  { %1166 = vst.msk [vmem:[#allocation4 + $0x10] sm:$0xff] %vm95_vm0, %v1158_v62 }
 0x2e7   :  { %v867_v53 = vpop.f32.mrf.mxu0  ;;  %v910_v6 = vpop.f32.mrf.mxu1 }
 0x2e8   :  { %v1159_v37 = vadd.f32 %v1151_v4, %v910_v6 }
 0x2e9   :  { %v1411_v41 = vpop.f32.mrf.mxu0  ;;  %v1416_v45 = vpop.f32.mrf.mxu1  ;;  %v1200_v33 = vld [vmem:[#allocation4 + $0x8] sm:$0xff] }
 0x2ea   :  { %1167 = vst.msk [vmem:[#allocation4 + $0x18] sm:$0xff] %vm95_vm0, %v1159_v37 }
 0x2eb   :  { %v913_v54 = vpop.f32.mrf.mxu1  ;;  %v956_v55 = vpop.f32.mrf.mxu0 }
 0x2ec   :  { %v1160_v58 = vadd.f32 %v1152_v49, %v956_v55 }
 0x2ed   :  { %v1417_v61 = vpop.f32.mrf.mxu1  ;;  %v1422_v1 = vpop.f32.mrf.mxu0  ;;  %v1201_v32 = vld [vmem:[#allocation4 + $0x10] sm:$0xff] }
 0x2ee   :  { %1168 = vst.msk [vmem:[#allocation4 + $0x20] sm:$0xff] %vm95_vm0, %v1160_v58 }
 0x2ef   :  { %v959_v10 = vpop.f32.mrf.mxu0  ;;  %v1002_v11 = vpop.f32.mrf.mxu1 }
 0x2f0   :  { %v1161_v12 = vadd.f32 %v1153_v2, %v1002_v11 }
 0x2f1   :  { %v1423_v13 = vpop.f32.mrf.mxu0  ;;  %v1428_v14 = vpop.f32.mrf.mxu1  ;;  %v1202_v40 = vld [vmem:[#allocation4 + $0x18] sm:$0xff] }
 0x2f2   :  { %1169 = vst.msk [vmem:[#allocation4 + $0x28] sm:$0xff] %vm95_vm0, %v1161_v12 }
 0x2f3   :  { %v1005_v17 = vpop.f32.mrf.mxu1  ;;  %v1048_v18 = vpop.f32.mrf.mxu0 }
 0x2f4   :  { %v1162_v19 = vadd.f32 %v1154_v15, %v1048_v18 }
 0x2f5   :  { %v1429_v22 = vpop.f32.mrf.mxu1  ;;  %v1434_v23 = vpop.f32.mrf.mxu0  ;;  %v1203_v44 = vld [vmem:[#allocation4 + $0x20] sm:$0xff] }
 0x2f6   :  { %1170 = vst.msk [vmem:[#allocation4 + $0x30] sm:$0xff] %vm95_vm0, %v1162_v19 }
 0x2f7   :  { %v1051_v35 = vpop.f32.mrf.mxu0  ;;  %v1094_v25 = vpop.f32.mrf.mxu1 }
 0x2f8   :  { %v1163_v26 = vadd.f32 %v1155_v24, %v1094_v25 }
 0x2f9   :  { %v1435_v36 = vpop.f32.mrf.mxu0  ;;  %v1440_v27 = vpop.f32.mrf.mxu1  ;;  %v1204_v48 = vld [vmem:[#allocation4 + $0x28] sm:$0xff] }
 0x2fa   :  { %1171 = vst.msk [vmem:[#allocation4 + $0x38] sm:$0xff] %vm95_vm0, %v1163_v26 }
 0x2fb   :  { %v1097_v28 = vpop.f32.mrf.mxu1 }
 0x2fd   :  { %v1441_v29 = vpop.f32.mrf.mxu1  ;;  %v1205_v57 = vld [vmem:[#allocation4 + $0x30] sm:$0xff] }
 0x301   :  { %v1206_v62 = vld [vmem:[#allocation4 + $0x38] sm:$0xff] }
 0x337   :  { %v1210_v31 = vpop.permute.xlu1 %1209 }
 0x338   :  { %v1247_v0 = vmul.f32 %v1210_v31, %v1199_v52 }
 0x33a   :  { %1255 = vst.msk [vmem:[#allocation13] sm:$0xff] %vm95_vm0, %v1247_v0 }
 0x33b   :  { %v1215_v38 = vpop.permute.xlu0 %1214 }
 0x33c   :  { %v1248_v30 = vmul.f32 %v1215_v38, %v1200_v33 }
 0x33e   :  { %1256 = vst.msk [vmem:[#allocation13 + $0x8] sm:$0xff] %vm95_vm0, %v1248_v30 }
 0x33f   :  { %v1220_v34 = vpop.permute.xlu1 %1219 }
 0x340   :  { %v1249_v39 = vmul.f32 %v1220_v34, %v1201_v32 }
 0x342   :  { %1257 = vst.msk [vmem:[#allocation13 + $0x10] sm:$0xff] %vm95_vm0, %v1249_v39 }
 0x343   :  { %v1225_v42 = vpop.permute.xlu0 %1224 }
 0x344   :  { %v1250_v43 = vmul.f32 %v1225_v42, %v1202_v40 }
 0x346   :  { %1258 = vst.msk [vmem:[#allocation13 + $0x18] sm:$0xff] %vm95_vm0, %v1250_v43 }
 0x347   :  { %v1230_v46 = vpop.permute.xlu1 %1229 }
 0x348   :  { %v1251_v47 = vmul.f32 %v1230_v46, %v1203_v44 }
 0x34a   :  { %1259 = vst.msk [vmem:[#allocation13 + $0x20] sm:$0xff] %vm95_vm0, %v1251_v47 }
 0x34b   :  { %v1235_v50 = vpop.permute.xlu0 %1234 }
 0x34c   :  { %v1252_v56 = vmul.f32 %v1235_v50, %v1204_v48 }
 0x34e   :  { %1260 = vst.msk [vmem:[#allocation13 + $0x28] sm:$0xff] %vm95_vm0, %v1252_v56 }
 0x34f   :  { %v1240_v59 = vpop.permute.xlu1 %1239 }
 0x350   :  { %v1253_v60 = vmul.f32 %v1240_v59, %v1205_v57 }
 0x352   :  { %1261 = vst.msk [vmem:[#allocation13 + $0x30] sm:$0xff] %vm95_vm0, %v1253_v60 }
 0x353   :  { %v1245_v63 = vpop.permute.xlu0 %1244 }
 0x354   :  { %v1254_v3 = vmul.f32 %v1245_v63, %v1206_v62 }
 0x356   :  { %1262 = vst.msk [vmem:[#allocation13 + $0x38] sm:$0xff] %vm95_vm0, %v1254_v3 }
 0x357   :  { %1601 = shalt.err (!%p1598_p10)
}
 0x358   :  { %s1631_s12 = smov 128   ;;  %s1632_s13 = smov 8  }
 0x359   :  { %1274 = dma.vmem_to_hbm [thread:$0]  %s1269_s3, 1024, %s1973_s4, [#allocation7], %s1631_s12, %s1631_s12, %s1632_s13  }
 0x35a   :  { %1616 = dma.done.wait [#allocation7], 1024  }
 0x35b   :  { %1617 = vsyncadd [#allocation7], 4294966272 }
 0x35c   :  { %1278 = vsyncpa [#allocation6], 1 }
 0x35d   :  { %1279 = vsyncpa [#allocation9], 1 }
 0x35e   :  { %1280 = vsyncpa [#allocation12], 1 }
 0x35f   :  { %1281 = vsyncpa [#allocation7], 1 }

</bundles_post_ra>
